<compile_context>
chip_gen: v6e
topology: v6e:2x2x1
jax: 0.10.0
libtpu: 0.0.40
codegen_flags: <defaults>
</compile_context>

<pallas_src>
import jax
import jax.numpy as jnp
from jax.experimental import pallas as pl
from jax.experimental.pallas import tpu as pltpu

BITS = 4  # bit-depth reduction defense: quantize to 2**BITS levels
TB = 8    # batch tile = native sublane count


def _round_up(n, m):
    return ((n + m - 1) // m) * m


def _pad_to(a, shape):
    """Zero-pad array `a` up to `shape` (no dim may shrink)."""
    pads = [(0, t - s) for s, t in zip(a.shape, shape)]
    if all(p == (0, 0) for p in pads):
        return a
    return jnp.pad(a, pads)


def _spec(block_shape, index_map, buffers=None):
    """BlockSpec helper; buffers=None keeps the default pipelining depth."""
    if buffers is None:
        return pl.BlockSpec(block_shape, index_map)
    return pl.BlockSpec(block_shape, index_map, pipeline_mode=pl.Buffered(buffers))


def _wrapped_model_kernel(x_ref, w1_ref, b1_ref, w2_ref, b2_ref, o_ref, acc_ref):
    # grid = (batch tiles [parallel], K tiles [arbitrary reduction])
    k = pl.program_id(1)

    # ---- init: fold bias1 into the f32 accumulator (free vs per-step add) ----
    @pl.when(k == 0)
    def _():
        acc_ref[...] = jnp.broadcast_to(b1_ref[...], acc_ref.shape)

    # ---- defense: bit-depth reduction (elementwise, f32 on VPU) ----
    levels = float(2 ** BITS - 1)
    x = jnp.clip(x_ref[...], 0.0, 1.0)
    defended = jnp.floor(x * levels + 0.5) * (1.0 / levels)

    # ---- layer 1: K-tiled bf16 matmul on the MXU, f32 accumulation ----
    acc_ref[...] += jnp.dot(
        defended.astype(jnp.bfloat16),
        w1_ref[...],
        preferred_element_type=jnp.float32,
    )

    # ---- finalize: ReLU -> layer 2 -> bias2 -> lane-dense store ----
    @pl.when(k == pl.num_programs(1) - 1)
    def _():
        h = jnp.maximum(acc_ref[...], 0.0)
        out = jnp.dot(
            h.astype(jnp.bfloat16),
            w2_ref[...],
            preferred_element_type=jnp.float32,
        )
        o_ref[...] = (out + b2_ref[...]).astype(o_ref.dtype)


def _select_tk(k_pad, hid, ncls):
    """VMEM-aware K-tile selection. Returns (TK, buffers_for_x_w1)."""
    budget = 24 << 20  # working-set budget (safe vs v5e 16 MiB default w/ raised limit,
                       # v6e 32 MiB default, v7x 64 MiB physical)
    # resident bytes: w2 (bf16), b1/b2 (f32), output (f32, assume 2 bufs), accumulator (f32)
    resident = hid * ncls * 2 + hid * 4 + ncls * 4 + 2 * TB * ncls * 4 + TB * hid * 4

    def streamed(tk, nbuf):
        # x block (TB, tk) f32 + w1 block (tk, hid) bf16, nbuf copies each
        return nbuf * (TB * tk * 4 + tk * hid * 2)

    # Collapse to a single K step when the whole thing fits comfortably.
    if k_pad <= 16384 and streamed(k_pad, 1) + resident <= budget:
        return k_pad, 1
    # Otherwise always tile (double-buffered) with the largest TK that fits.
    for tk in (8192, 4096, 2048, 1024, 512, 256, 128):
        if k_pad % tk == 0 and streamed(tk, 2) + resident <= budget:
            return tk, None  # None -> default (double) buffering
    return 128, None


def wrapped_model_forward(x_nchw, w1, b1, w2, b2):
    """x_nchw: [B, C, H, W] float32. w1: [K, HIDDEN], w2: [HIDDEN, NUM_CLASSES].

    Returns logits [B, NUM_CLASSES] (float32).
    """
    B = x_nchw.shape[0]
    K = x_nchw.shape[1] * x_nchw.shape[2] * x_nchw.shape[3]
    hidden = w1.shape[1]
    ncls = w2.shape[1]

    # padded, hardware-friendly dims
    B_pad = _round_up(max(B, TB), TB)          # full 8-row sublane tiles
    K_pad = _round_up(K, 128)                  # always tileable along K
    HID = _round_up(max(hidden, 128), 128)     # lane-dense hidden
    NCLS = _round_up(max(ncls, 128), 128)      # lane-dense classes

    # glue: flatten NCHW -> [B, K] row-major (matches torch .view(B, -1)), then pad.
    # Zero-padded x columns hit zero-padded w1 rows, and zero-padded batch rows /
    # class lanes are sliced off below, so padding is exact.
    x_flat = _pad_to(x_nchw.reshape(B, K).astype(jnp.float32), (B_pad, K_pad))

    # pad weights/biases; matmul operands in bf16 (MXU-native, halves weight DMA)
    w1_p = _pad_to(w1, (K_pad, HID)).astype(jnp.bfloat16)
    w2_p = _pad_to(w2, (HID, NCLS)).astype(jnp.bfloat16)
    b1_p = _pad_to(b1.reshape(1, hidden), (1, HID)).astype(jnp.float32)
    b2_p = _pad_to(b2.reshape(1, ncls), (1, NCLS)).astype(jnp.float32)

    # VMEM-aware K tiling (collapses to one step at small K)
    TK, xw_buffers = _select_tk(K_pad, HID, NCLS)
    nk = K_pad // TK
    nb = B_pad // TB

    # explicit VMEM limit, sized from the actual working set (guards v5e's 16 MiB
    # default scoped limit at large TK, stays well under v7x's 64 MiB physical)
    streamed_bytes = (1 if xw_buffers == 1 else 2) * (TB * TK * 4 + TK * HID * 2)
    resident_bytes = HID * NCLS * 2 + HID * 4 + NCLS * 4 + 2 * TB * NCLS * 4 + TB * HID * 4
    vmem_limit = int(min(48 << 20, max(32 << 20, streamed_bytes + resident_bytes + (4 << 20))))

    cost = pl.CostEstimate(
        flops=2 * B_pad * (K_pad * HID + HID * NCLS),
        transcendentals=0,
        bytes_accessed=(
            x_flat.size * 4
            + w1_p.size * 2
            + w2_p.size * 2
            + b1_p.size * 4
            + b2_p.size * 4
            + B_pad * NCLS * 4
        ),
    )

    out_padded = pl.pallas_call(
        _wrapped_model_kernel,
        out_shape=jax.ShapeDtypeStruct((B_pad, NCLS), jnp.float32),
        grid_spec=pltpu.PrefetchScalarGridSpec(
            num_scalar_prefetch=0,
            grid=(nb, nk),
            in_specs=[
                _spec((TB, TK), lambda b, k: (b, k), xw_buffers),     # x: stream K tiles
                _spec((TK, HID), lambda b, k: (k, 0), xw_buffers),    # w1: stream K tiles
                _spec((1, HID), lambda b, k: (0, 0), buffers=1),      # b1: resident, 1 buffer
                _spec((HID, NCLS), lambda b, k: (0, 0), buffers=1),   # w2: resident, 1 buffer
                _spec((1, NCLS), lambda b, k: (0, 0), buffers=1),     # b2: resident, 1 buffer
            ],
            out_specs=pl.BlockSpec((TB, NCLS), lambda b, k: (b, 0)),  # resident across K
            scratch_shapes=[pltpu.VMEM((TB, HID), jnp.float32)],      # f32 accumulator
        ),
        compiler_params=pltpu.CompilerParams(
            dimension_semantics=("parallel", "arbitrary"),  # batch parallel, K reduction
            vmem_limit_bytes=vmem_limit,
        ),
        cost_estimate=cost,
    )(x_flat, w1_p, b1_p, w2_p, b2_p)

    # slice padded logits back to the real batch / class count
    return out_padded[:B, :ncls]


if __name__ == "__main__":
    # small shapes consistent with an image-classification forward pass
    B, C, H, W = 2, 4, 16, 16
    HIDDEN, NUM_CLASSES = 32, 10
    IN_FEATURES = C * H * W

    key = jax.random.PRNGKey(0)
    kx, kw1, kb1, kw2, kb2 = jax.random.split(key, 5)

    # inputs in [0, 1] like normalized images
    x = jax.random.uniform(kx, (B, C, H, W), dtype=jnp.float32)

    # deterministic synthetic parameters (no checkpoint loading)
    w1 = jax.random.normal(kw1, (IN_FEATURES, HIDDEN), dtype=jnp.float32) * 0.02
    b1 = jax.random.normal(kb1, (HIDDEN,), dtype=jnp.float32) * 0.01
    w2 = jax.random.normal(kw2, (HIDDEN, NUM_CLASSES), dtype=jnp.float32) * 0.02
    b2 = jax.random.normal(kb2, (NUM_CLASSES,), dtype=jnp.float32) * 0.01

    out = wrapped_model_forward(x, w1, b1, w2, b2)
    jax.block_until_ready(out)

    # pure-JAX reference of the same fused computation (same bf16 matmul dtype)
    levels = float(2 ** BITS - 1)
    dx = jnp.floor(jnp.clip(x.reshape(B, -1), 0.0, 1.0) * levels + 0.5) / levels
    h_ref = jnp.maximum(
        jnp.dot(dx.astype(jnp.bfloat16), w1.astype(jnp.bfloat16),
                preferred_element_type=jnp.float32) + b1,
        0.0,
    )
    ref = jnp.dot(h_ref.astype(jnp.bfloat16), w2.astype(jnp.bfloat16),
                  preferred_element_type=jnp.float32) + b2

    assert out.shape == (B, NUM_CLASSES)
    assert jnp.allclose(out, ref, atol=1e-2, rtol=1e-2)

    print("KERNEL_OK")
</pallas_src>

<mosaic_0001>
module attributes {stable_mosaic.version = 11 : i64} {
  func.func @_wrapped_model_kernel(%arg0: i32, %arg1: i32, %arg2: memref<8x1024xf32, #tpu.memory_space<vmem>>, %arg3: memref<1024x128xbf16, #tpu.memory_space<vmem>>, %arg4: memref<1x128xf32, #tpu.memory_space<vmem>>, %arg5: memref<128x128xbf16, #tpu.memory_space<vmem>>, %arg6: memref<1x128xf32, #tpu.memory_space<vmem>>, %arg7: memref<8x128xf32, #tpu.memory_space<vmem>>, %arg8: memref<8x128xf32, #tpu.memory_space<vmem>>) attributes {dimension_semantics = [#tpu.dimension_semantics<parallel>, #tpu.dimension_semantics<arbitrary>], iteration_bounds = array<i64: 1, 1>, scalar_prefetch = 0 : i64, scratch_operands = 1 : i64, tpu.core_type = #tpu.core_type<tc>, window_params = [{pipeline_mode = #tpu.pipeline_mode<synchronous>, transform_indices = @transform_0, window_bounds = array<i64: 8, 1024>}, {pipeline_mode = #tpu.pipeline_mode<synchronous>, transform_indices = @transform_1, window_bounds = array<i64: 1024, 128>}, {pipeline_mode = #tpu.pipeline_mode<synchronous>, transform_indices = @transform_2, window_bounds = array<i64: 1, 128>}, {pipeline_mode = #tpu.pipeline_mode<synchronous>, transform_indices = @transform_3, window_bounds = array<i64: 128, 128>}, {pipeline_mode = #tpu.pipeline_mode<synchronous>, transform_indices = @transform_4, window_bounds = array<i64: 1, 128>}, {transform_indices = @transform_5, window_bounds = array<i64: 8, 128>}]} {
    %c0_i32 = arith.constant 0 : i32
    %0 = arith.cmpi eq, %arg1, %c0_i32 : i32
    %1 = arith.extui %0 : i1 to i32
    %c0_i32_0 = arith.constant 0 : i32
    %2 = arith.cmpi ne, %1, %c0_i32_0 : i32
    scf.if %2 {
      %c0_15 = arith.constant 0 : index
      %c0_16 = arith.constant 0 : index
      %24 = vector.load %arg4[%c0_15, %c0_16] : memref<1x128xf32, #tpu.memory_space<vmem>>, vector<1x128xf32>
      %25 = vector.shape_cast %24 : vector<1x128xf32> to vector<1x128xf32>
      %26 = vector.broadcast %25 : vector<1x128xf32> to vector<8x128xf32>
      %c0_17 = arith.constant 0 : index
      %c0_18 = arith.constant 0 : index
      %27 = vector.load %arg8[%c0_17, %c0_18] : memref<8x128xf32, #tpu.memory_space<vmem>>, vector<8x128xf32>
      tpu.vector_store %arg8[%c0_17, %c0_18], %26 {strides = array<i32>} : memref<8x128xf32, #tpu.memory_space<vmem>>, vector<8x128xf32>,
    } else {
    }
    %c0 = arith.constant 0 : index
    %c0_1 = arith.constant 0 : index
    %3 = vector.load %arg2[%c0, %c0_1] : memref<8x1024xf32, #tpu.memory_space<vmem>>, vector<8x1024xf32>
    %cst = arith.constant 0.000000e+00 : f32
    %cst_2 = arith.constant 1.000000e+00 : f32
    %4 = vector.broadcast %cst : f32 to vector<8x1024xf32>
    %5 = arith.maximumf %4, %3 : vector<8x1024xf32>
    %6 = vector.broadcast %cst_2 : f32 to vector<8x1024xf32>
    %7 = arith.minimumf %6, %5 : vector<8x1024xf32>
    %cst_3 = arith.constant 1.500000e+01 : f32
    %8 = vector.broadcast %cst_3 : f32 to vector<8x1024xf32>
    %9 = arith.mulf %7, %8 : vector<8x1024xf32>
    %cst_4 = arith.constant 5.000000e-01 : f32
    %10 = vector.broadcast %cst_4 : f32 to vector<8x1024xf32>
    %11 = arith.addf %9, %10 : vector<8x1024xf32>
    %12 = math.floor %11 : vector<8x1024xf32>
    %cst_5 = arith.constant 0.0666666701 : f32
    %13 = vector.broadcast %cst_5 : f32 to vector<8x1024xf32>
    %14 = arith.mulf %12, %13 : vector<8x1024xf32>
    %c0_6 = arith.constant 0 : index
    %c0_7 = arith.constant 0 : index
    %15 = vector.load %arg8[%c0_6, %c0_7] : memref<8x128xf32, #tpu.memory_space<vmem>>, vector<8x128xf32>
    %16 = arith.truncf %14 : vector<8x1024xf32> to vector<8x1024xbf16>
    %c0_8 = arith.constant 0 : index
    %c0_9 = arith.constant 0 : index
    %17 = vector.load %arg3[%c0_8, %c0_9] : memref<1024x128xbf16, #tpu.memory_space<vmem>>, vector<1024x128xbf16>
    %cst_10 = arith.constant dense<0.000000e+00> : vector<8x128xf32>
    %18 = tpu.matmul %16, %17, %cst_10 {dimension_numbers = #tpu.dot_dimension_numbers<[1], [0], [0], [1], [0, 0, 1, 1], [], []>} : vector<8x1024xbf16>, vector<1024x128xbf16>, vector<8x128xf32> -> vector<8x128xf32>
    %19 = arith.addf %15, %18 : vector<8x128xf32>
    %c0_11 = arith.constant 0 : index
    %c0_12 = arith.constant 0 : index
    %20 = vector.load %arg8[%c0_11, %c0_12] : memref<8x128xf32, #tpu.memory_space<vmem>>, vector<8x128xf32>
    tpu.vector_store %arg8[%c0_11, %c0_12], %19 {strides = array<i32>} : memref<8x128xf32, #tpu.memory_space<vmem>>, vector<8x128xf32>,
    %c0_i32_13 = arith.constant 0 : i32
    %21 = arith.cmpi eq, %arg1, %c0_i32_13 : i32
    %22 = arith.extui %21 : i1 to i32
    %c0_i32_14 = arith.constant 0 : i32
    %23 = arith.cmpi ne, %22, %c0_i32_14 : i32
    scf.if %23 {
      %c0_15 = arith.constant 0 : index
      %c0_16 = arith.constant 0 : index
      %24 = vector.load %arg8[%c0_15, %c0_16] : memref<8x128xf32, #tpu.memory_space<vmem>>, vector<8x128xf32>
      %cst_17 = arith.constant 0.000000e+00 : f32
      %25 = vector.broadcast %cst_17 : f32 to vector<8x128xf32>
      %26 = arith.maximumf %24, %25 : vector<8x128xf32>
      %27 = arith.truncf %26 : vector<8x128xf32> to vector<8x128xbf16>
      %c0_18 = arith.constant 0 : index
      %c0_19 = arith.constant 0 : index
      %28 = vector.load %arg5[%c0_18, %c0_19] : memref<128x128xbf16, #tpu.memory_space<vmem>>, vector<128x128xbf16>
      %cst_20 = arith.constant dense<0.000000e+00> : vector<8x128xf32>
      %29 = tpu.matmul %27, %28, %cst_20 {dimension_numbers = #tpu.dot_dimension_numbers<[1], [0], [0], [1], [0, 0, 1, 1], [], []>} : vector<8x128xbf16>, vector<128x128xbf16>, vector<8x128xf32> -> vector<8x128xf32>
      %c0_21 = arith.constant 0 : index
      %c0_22 = arith.constant 0 : index
      %30 = vector.load %arg6[%c0_21, %c0_22] : memref<1x128xf32, #tpu.memory_space<vmem>>, vector<1x128xf32>
      %31 = vector.broadcast %30 : vector<1x128xf32> to vector<8x128xf32>
      %32 = arith.addf %29, %31 : vector<8x128xf32>
      %c0_23 = arith.constant 0 : index
      %c0_24 = arith.constant 0 : index
      %33 = vector.load %arg7[%c0_23, %c0_24] : memref<8x128xf32, #tpu.memory_space<vmem>>, vector<8x128xf32>
      tpu.vector_store %arg7[%c0_23, %c0_24], %32 {strides = array<i32>} : memref<8x128xf32, #tpu.memory_space<vmem>>, vector<8x128xf32>,
    } else {
    }
    return
  }
  func.func @transform_0(%arg0: i32, %arg1: i32) -> (i32, i32) {
    %c0_i32 = arith.constant 0 : i32
    return %arg0, %arg1 : i32, i32
  }
  func.func @transform_1(%arg0: i32, %arg1: i32) -> (i32, i32) {
    %c0_i32 = arith.constant 0 : i32
    %c0_i32_0 = arith.constant 0 : i32
    return %arg1, %c0_i32 : i32, i32
  }
  func.func @transform_2(%arg0: i32, %arg1: i32) -> (i32, i32) {
    %c0_i32 = arith.constant 0 : i32
    %c0_i32_0 = arith.constant 0 : i32
    %c0_i32_1 = arith.constant 0 : i32
    return %c0_i32, %c0_i32_0 : i32, i32
  }
  func.func @transform_3(%arg0: i32, %arg1: i32) -> (i32, i32) {
    %c0_i32 = arith.constant 0 : i32
    %c0_i32_0 = arith.constant 0 : i32
    %c0_i32_1 = arith.constant 0 : i32
    return %c0_i32, %c0_i32_0 : i32, i32
  }
  func.func @transform_4(%arg0: i32, %arg1: i32) -> (i32, i32) {
    %c0_i32 = arith.constant 0 : i32
    %c0_i32_0 = arith.constant 0 : i32
    %c0_i32_1 = arith.constant 0 : i32
    return %c0_i32, %c0_i32_0 : i32, i32
  }
  func.func @transform_5(%arg0: i32, %arg1: i32) -> (i32, i32) {
    %c0_i32 = arith.constant 0 : i32
    %c0_i32_0 = arith.constant 0 : i32
    return %arg0, %c0_i32 : i32, i32
  }
}

</mosaic_0001>

<bundles_post_ra>
// kernel: tpu_custom_call.1
= control target key start
LH: loop header
LB: loop body
LE: loop exit
PB: predicated region body
PF: predicated region fallthrough
CT: control target
= control target key end

     0   :  { %10 = vsyncpa [#allocation4], 0  ;;  %s1359_s0 = inlined_call_operand.hbm [shape: f32[8,1024], index: 0, kind: input, shape index: {}]   ;;  %s1360_s1 = inlined_call_operand.hbm [shape: bf16[1024,128], index: 1, kind: input, shape index: {}]   ;;  %s1361_s2 = inlined_call_operand.vmem [shape: f32[1,128], index: 2, kind: input, shape index: {}]   ;;  %s1362_s3 = inlined_call_operand.hbm [shape: bf16[128,128], index: 3, kind: input, shape index: {}]   ;;  %s1363_s4 = inlined_call_operand.vmem [shape: f32[1,128], index: 4, kind: input, shape index: {}]   ;;  %s1364_s5 = inlined_call_operand.hbm [shape: f32[8,128], index: 5, kind: output, shape index: {}]  }
   0x1   :  { %11 = vsyncpa [#allocation7], 0 }
   0x2   :  { %12 = vsyncpa [#allocation5], 0  ;;  %s1303_s18 = smov [#allocation6]  }
   0x3   :  { %s28_s19 = sshll.u32 %s1303_s18, 4  ;;  %s29_s19 = int_to_ptr.vmem [resolvable:$true] %s28_s19 }
   0x4   :  { %s1225_s20 = scalar_lea.vmem %s29_s19, 8192  ;;  %p1230_p1 = scmp.lt.s32.totalorder %s29_s19, %s29_s19 }
   0x5   :  { %p1226_p0 = scmp.ne.s32.totalorder %s29_s19, %s1225_s20  ;;  %p1231_p2 = scmp.lt.s32.totalorder %s1225_s20, %s1225_s20 }
   0x7   :  { %p1232_p3 = por %p1231_p2, %p1230_p1 }
   0x9   :  { %p1233_p4 = pnand %p1232_p3, %p1226_p0 }
   0xb   :  { %1236 = shalt.err (!%p1233_p4)
}
   0xc   :  { %s1304_s21 = smov 64   ;;  %s1305_s22 = smov 4  }
   0xd   :  { %34 = dma.hbm_to_vmem [thread:$0]  %s1360_s1, 8192, %s29_s19, [#allocation7], %s1304_s21, %s1304_s21, %s1305_s22  }
   0xe   :  { %s1306_s25 = smov [#allocation3]   ;;  %s1307_s27 = smov [#allocation8]  }
   0xf   :  { %s19_s26 = sshll.u32 %s1306_s25, 4  ;;  %s42_s28 = sshll.u32 %s1307_s27, 4  ;;  %s20_s26 = int_to_ptr.vmem [resolvable:$true] %s19_s26  ;;  %s43_s28 = int_to_ptr.vmem [resolvable:$true] %s42_s28 }
  0x10   :  { %s1245_s29 = scalar_lea.vmem %s20_s26, 1024  ;;  %p1250_p6 = scmp.lt.s32.totalorder %s20_s26, %s20_s26 }
  0x11   :  { %p1246_p5 = scmp.ne.s32.totalorder %s20_s26, %s1245_s29  ;;  %p1251_p7 = scmp.lt.s32.totalorder %s1245_s29, %s1245_s29 }
  0x13   :  { %p1252_p8 = por %p1251_p7, %p1250_p6 }
  0x15   :  { %p1253_p9 = pnand %p1252_p8, %p1246_p5 }
  0x17   :  { %1256 = shalt.err (!%p1253_p9)
}
  0x18   :  { %22 = dma.hbm_to_vmem [thread:$0]  %s1359_s0, 1024, %s20_s26, [#allocation4]  }
  0x19   :  { %s1265_s7 = scalar_lea.vmem %s43_s28, 1024  ;;  %p1270_p11 = scmp.lt.s32.totalorder %s43_s28, %s43_s28 }
  0x1a   :  { %p1266_p10 = scmp.ne.s32.totalorder %s43_s28, %s1265_s7  ;;  %p1271_p12 = scmp.lt.s32.totalorder %s1265_s7, %s1265_s7 }
  0x1c   :  { %p1272_p13 = por %p1271_p12, %p1270_p11 }
  0x1e   :  { %p1273_p0 = pnand %p1272_p13, %p1266_p10 }
  0x20   :  { %1276 = shalt.err (!%p1273_p0)
}
  0x21   :  { %48 = dma.hbm_to_vmem [thread:$0]  %s1362_s3, 1024, %s43_s28, [#allocation7], %s1304_s21, %s1304_s21, %s1305_s22  }
  0x22   :  { %1297 = dma.done.wait [#allocation4], 1024  }
  0x23   :  { %1298 = vsyncadd [#allocation4], 4294966272 }
  0x24   :  { %1299 = dma.done.wait [#allocation7], 9216  }
  0x25   :  { %1300 = vsyncadd [#allocation7], 4294958080  ;;  %v1145_v0 = vld [vmem:[#allocation6 + $0x78] sm:$0xff]   ;;  %v1149_v4 = vld [vmem:[#allocation6 + $0x70] sm:$0xff]   ;;  %vm1309_vm0 = vmmov 0   ;;  %s1310_s11 = smov [#allocation9]  }
  0x26   :  { %v1146_v1 = vld [vmem:[#allocation6 + $0xf8] sm:$0xff]   ;;  %1020 = vmatprep.subr.bf16.mxu0 %v1145_v0  ;;  %v1150_v5 = vld [vmem:[#allocation6 + $0xf0] sm:$0xff]   ;;  %v1153_v8 = vld [vmem:[#allocation6 + $0x68] sm:$0xff]   ;;  %s936_s12 = sshll.u32 %s1310_s11, 4  ;;  %s937_s12 = int_to_ptr.vmem [resolvable:$true] %s936_s12 }
  0x27   :  { %v1147_v2 = vld [vmem:[#allocation6 + $0x38] sm:$0xff]   ;;  %1042 = vmatprep.subr.bf16.mxu1 %v1146_v1  ;;  %v1151_v6 = vld [vmem:[#allocation6 + $0x30] sm:$0xff]   ;;  %v1154_v9 = vld [vmem:[#allocation6 + $0xe8] sm:$0xff]   ;;  %p1282_p2 = scmp.lt.s32.totalorder %s937_s12, %s937_s12 }
  0x28   :  { %v1148_v3 = vld [vmem:[#allocation6 + $0xb8] sm:$0xff]   ;;  %1021 = vmatpush3.bf16.msra.mxu0 %v1147_v2  ;;  %v1152_v7 = vld [vmem:[#allocation6 + $0xb0] sm:$0xff]   ;;  %v1155_v10 = vld [vmem:[#allocation6 + $0x28] sm:$0xff]  }
  0x29   :  { %1043 = vmatpush3.bf16.msra.mxu1 %v1148_v3  ;;  %1022 = vmatprep.subr.bf16.mxu0 %v1149_v4  ;;  %v1156_v11 = vld [vmem:[#allocation6 + $0xa8] sm:$0xff]   ;;  %v1157_v12 = vld [vmem:[#allocation6 + $0x60] sm:$0xff]   ;;  %v1161_v16 = vld [vmem:[#allocation6 + $0x58] sm:$0xff]  }
  0x2a   :  { %1044 = vmatprep.subr.bf16.mxu1 %v1150_v5  ;;  %v1158_v13 = vld [vmem:[#allocation6 + $0xe0] sm:$0xff]   ;;  %v1162_v17 = vld [vmem:[#allocation6 + $0xd8] sm:$0xff]   ;;  %v1165_v20 = vld [vmem:[#allocation6 + $0x50] sm:$0xff]  }
  0x2b   :  { %v1159_v14 = vld [vmem:[#allocation6 + $0x20] sm:$0xff]   ;;  %v1163_v18 = vld [vmem:[#allocation6 + $0x18] sm:$0xff]   ;;  %v1166_v21 = vld [vmem:[#allocation6 + $0xd0] sm:$0xff]  }
  0x2c   :  { %1023 = vmatpush3.bf16.msra.mxu0 %v1151_v6  ;;  %v1160_v15 = vld [vmem:[#allocation6 + $0xa0] sm:$0xff]   ;;  %v1164_v19 = vld [vmem:[#allocation6 + $0x98] sm:$0xff]   ;;  %v1167_v22 = vld [vmem:[#allocation6 + $0x10] sm:$0xff]  }
  0x2d   :  { %1045 = vmatpush3.bf16.msra.mxu1 %v1152_v7  ;;  %1024 = vmatprep.subr.bf16.mxu0 %v1153_v8  ;;  %v1168_v23 = vld [vmem:[#allocation6 + $0x90] sm:$0xff]   ;;  %v1169_v24 = vld [vmem:[#allocation6 + $0x48] sm:$0xff]   ;;  %v1173_v28 = vld [vmem:[#allocation6 + $0x40] sm:$0xff]  }
  0x2e   :  { %1046 = vmatprep.subr.bf16.mxu1 %v1154_v9  ;;  %v1170_v25 = vld [vmem:[#allocation6 + $0xc8] sm:$0xff]   ;;  %v1174_v29 = vld [vmem:[#allocation6 + $0xc0] sm:$0xff]   ;;  %v76_v33 = vld [vmem:[#allocation3 + $0x18] sm:$0xff] }
  0x2f   :  { %v1171_v26 = vld [vmem:[#allocation6 + $0x8] sm:$0xff]   ;;  %v1175_v30 = vld [vmem:[#allocation6] sm:$0xff]   ;;  %v84_v36 = vmax.f32 %v76_v33, 0.0  ;;  %v75_v38 = vld [vmem:[#allocation3 + $0x10] sm:$0xff] }
  0x30   :  { %1025 = vmatpush3.bf16.msra.mxu0 %v1155_v10  ;;  %v1172_v27 = vld [vmem:[#allocation6 + $0x88] sm:$0xff]   ;;  %v1176_v31 = vld [vmem:[#allocation6 + $0x80] sm:$0xff]   ;;  %v83_v39 = vmax.f32 %v75_v38, 0.0  ;;  %v1177_v40 = vld [vmem:[#allocation6 + $0x178] sm:$0xff]  }
  0x31   :  { %1047 = vmatpush3.bf16.msra.mxu1 %v1156_v11  ;;  %1026 = vmatprep.subr.bf16.mxu0 %v1157_v12  ;;  %v74_v32 = vld [vmem:[#allocation3 + $0x8] sm:$0xff]  ;;  %v73_v34 = vld [vmem:[#allocation3] sm:$0xff]  ;;  %v92_v42 = vmin.f32 %v84_v36, 1.0  ;;  %v1178_v44 = vld [vmem:[#allocation6 + $0x1f8] sm:$0xff]  }
  0x32   :  { %1048 = vmatprep.subr.bf16.mxu1 %v1158_v13  ;;  %v82_v35 = vmax.f32 %v74_v32, 0.0  ;;  %v81_v37 = vmax.f32 %v73_v34, 0.0  ;;  %v91_v45 = vmin.f32 %v83_v39, 1.0  ;;  %v1179_v61 = vld [vmem:[#allocation6 + $0x138] sm:$0xff]   ;;  %v1181_v0 = vld [vmem:[#allocation6 + $0x170] sm:$0xff]   ;;  %v1185_v8 = vld [vmem:[#allocation6 + $0x168] sm:$0xff]  }
  0x33   :  { %v100_v47 = vmul.f32 15.0, %v92_v42  ;;  %v1180_v63 = vld [vmem:[#allocation6 + $0x1b8] sm:$0xff]   ;;  %v1182_v5 = vld [vmem:[#allocation6 + $0x1f0] sm:$0xff]   ;;  %v1186_v9 = vld [vmem:[#allocation6 + $0x1e8] sm:$0xff]  }
  0x34   :  { %1027 = vmatpush3.bf16.msra.mxu0 %v1159_v14  ;;  %v90_v41 = vmin.f32 %v82_v35, 1.0  ;;  %v89_v43 = vmin.f32 %v81_v37, 1.0  ;;  %v99_v49 = vmul.f32 15.0, %v91_v45  ;;  %v1183_v6 = vld [vmem:[#allocation6 + $0x130] sm:$0xff]   ;;  %v1187_v10 = vld [vmem:[#allocation6 + $0x128] sm:$0xff]   ;;  %v1189_v12 = vld [vmem:[#allocation6 + $0x160] sm:$0xff]  }
  0x35   :  { %1049 = vmatpush3.bf16.msra.mxu1 %v1160_v15  ;;  %1028 = vmatprep.subr.bf16.mxu0 %v1161_v16  ;;  %v108_v51 = vadd.f32 0.5, %v100_v47  ;;  %v1184_v7 = vld [vmem:[#allocation6 + $0x1b0] sm:$0xff]   ;;  %v1188_v11 = vld [vmem:[#allocation6 + $0x1a8] sm:$0xff]   ;;  %v1190_v13 = vld [vmem:[#allocation6 + $0x1e0] sm:$0xff]  }
  0x36   :  { %1050 = vmatprep.subr.bf16.mxu1 %v1162_v17  ;;  %v98_v46 = vmul.f32 15.0, %v90_v41  ;;  %v97_v48 = vmul.f32 15.0, %v89_v43  ;;  %v107_v53 = vadd.f32 0.5, %v99_v49  ;;  %v1191_v14 = vld [vmem:[#allocation6 + $0x120] sm:$0xff]   ;;  %v1193_v16 = vld [vmem:[#allocation6 + $0x158] sm:$0xff]   ;;  %v79_v32 = vld [vmem:[#allocation3 + $0x30] sm:$0xff] }
  0x37   :  { %v116_v55 = vfloor.f32 %v108_v51  ;;  %v1192_v15 = vld [vmem:[#allocation6 + $0x1a0] sm:$0xff]   ;;  %v1194_v17 = vld [vmem:[#allocation6 + $0x1d8] sm:$0xff]   ;;  %v87_v36 = vmax.f32 %v79_v32, 0.0 }
  0x38   :  { %1029 = vmatpush3.bf16.msra.mxu0 %v1163_v18  ;;  %v106_v50 = vadd.f32 0.5, %v98_v46  ;;  %v105_v52 = vadd.f32 0.5, %v97_v48  ;;  %v115_v57 = vfloor.f32 %v107_v53  ;;  %v1195_v18 = vld [vmem:[#allocation6 + $0x118] sm:$0xff]   ;;  %v1205_v33 = vld [vmem:[#allocation6 + $0x140] sm:$0xff]  }
  0x39   :  { %1051 = vmatpush3.bf16.msra.mxu1 %v1164_v19  ;;  %1030 = vmatprep.subr.bf16.mxu0 %v1165_v20  ;;  %v124_v59 = vmul.f32 0.06666667, %v116_v55  ;;  %v1196_v19 = vld [vmem:[#allocation6 + $0x198] sm:$0xff]   ;;  %v1197_v20 = vld [vmem:[#allocation6 + $0x150] sm:$0xff]   ;;  %v1206_v37 = vld [vmem:[#allocation6 + $0x1c0] sm:$0xff]   ;;  %v95_v41 = vmin.f32 %v87_v36, 1.0 }
  0x3a   :  { %1052 = vmatprep.subr.bf16.mxu1 %v1166_v21  ;;  %v114_v54 = vfloor.f32 %v106_v50  ;;  %v113_v56 = vfloor.f32 %v105_v52  ;;  %v123_v62 = vmul.f32 0.06666667, %v115_v57  ;;  %v1198_v21 = vld [vmem:[#allocation6 + $0x1d0] sm:$0xff]   ;;  %v1207_v42 = vld [vmem:[#allocation6 + $0x100] sm:$0xff]  }
  0x3b   :  { %v133_v2 = vpack.c.bf16 %v124_v59, %v124_v59  ;;  %v103_v47 = vmul.f32 15.0, %v95_v41  ;;  %v1011_v36 = vld [vmem:[%s1363_s4] ss:$0 sm:$0xff] }
  0x3c   :  { %1031 = vmatpush3.bf16.msra.mxu0 %v1167_v22  ;;  %v122_v58 = vmul.f32 0.06666667, %v114_v54  ;;  %v121_v60 = vmul.f32 0.06666667, %v113_v56  ;;  %v132_v4 = vpack.c.bf16 %v123_v62, %v123_v62  ;;  %v1199_v22 = vld [vmem:[#allocation6 + $0x110] sm:$0xff]  }
  0x3d   :  { %1053 = vmatpush3.bf16.msra.mxu1 %v1168_v23  ;;  %1032 = vmatprep.subr.bf16.mxu0 %v1169_v24  ;;  %v1200_v23 = vld [vmem:[#allocation6 + $0x190] sm:$0xff]   ;;  %v1201_v24 = vld [vmem:[#allocation6 + $0x148] sm:$0xff]   ;;  %v111_v51 = vadd.f32 0.5, %v103_v47 }
  0x3e   :  { %1054 = vmatprep.subr.bf16.mxu1 %v1170_v25  ;;  %v131_v1 = vpack.c.bf16 %v122_v58, %v122_v58  ;;  %v130_v3 = vpack.c.bf16 %v121_v60, %v121_v60  ;;  %722 = vmatprep.mubr.bf16.mxu1 %v133_v2  ;;  %v1202_v25 = vld [vmem:[#allocation6 + $0x1c8] sm:$0xff]   ;;  %v1210_v2 = vld [vmem:[#allocation8 + $0x30] sm:$0xff]  }
  0x3f   :  { %v119_v55 = vfloor.f32 %v111_v51 }
  0x40   :  { %1033 = vmatpush3.bf16.msra.mxu0 %v1171_v26  ;;  %682 = vmatprep.mubr.bf16.mxu0 %v131_v1  ;;  %v1203_v26 = vld [vmem:[#allocation6 + $0x108] sm:$0xff]   ;;  %v1308_v1 = vmov 0.0  }
  0x41   :  { %1055 = vmatpush3.bf16.msra.mxu1 %v1172_v27  ;;  %1034 = vmatprep.subr.bf16.mxu0 %v1173_v28  ;;  %v1204_v27 = vld [vmem:[#allocation6 + $0x188] sm:$0xff]   ;;  %v127_v59 = vmul.f32 0.06666667, %v119_v55 }
  0x42   :  { %1056 = vmatprep.subr.bf16.mxu1 %v1174_v29  ;;  %v78_v28 = vld [vmem:[#allocation3 + $0x28] sm:$0xff] }
  0x43   :  { %v86_v29 = vmax.f32 %v78_v28, 0.0 }
  0x44   :  { %1035 = vmatpush3.bf16.msra.mxu0 %v1175_v30  ;;  %v80_v30 = vld [vmem:[#allocation3 + $0x38] sm:$0xff] }
  0x45   :  { %1057 = vmatpush3.bf16.msra.mxu1 %v1176_v31  ;;  %1064 = vmatprep.subr.bf16.mxu0 %v1177_v40  ;;  %v77_v31 = vld [vmem:[#allocation3 + $0x20] sm:$0xff]  ;;  %v88_v34 = vmax.f32 %v80_v30, 0.0  ;;  %v94_v38 = vmin.f32 %v86_v29, 1.0 }
  0x46   :  { %1086 = vmatprep.subr.bf16.mxu1 %v1178_v44  ;;  %v85_v35 = vmax.f32 %v77_v31, 0.0  ;;  %v1208_v44 = vld [vmem:[#allocation6 + $0x180] sm:$0xff]  }
  0x47   :  { %683 = vmatmul.mubr.bf16.vlgmr.msra.gmra.mxu0 %v130_v3  ;;  %v96_v39 = vmin.f32 %v88_v34, 1.0  ;;  %v102_v43 = vmul.f32 15.0, %v94_v38  ;;  %v1211_v3 = vld [vmem:[#allocation8 + $0x28] sm:$0xff]   ;;  %v946_v29 = vld [vmem:[%s1361_s2] ss:$0 sm:$0xff]  ;;  %s1277_s2 = scalar_lea.vmem %s937_s12, 128 }
  0x48   :  { %723 = vmatmul.mubr.bf16.vlgmr.msra.gmra.mxu1 %v132_v4  ;;  %1065 = vmatpush3.bf16.msra.mxu0 %v1179_v61  ;;  %v93_v40 = vmin.f32 %v85_v35, 1.0  ;;  %v1212_v4 = vld [vmem:[#allocation8 + $0x20] sm:$0xff]   ;;  %p1278_p1 = scmp.ne.s32.totalorder %s937_s12, %s1277_s2  ;;  %p1283_p3 = scmp.lt.s32.totalorder %s1277_s2, %s1277_s2 }
  0x49   :  { %1087 = vmatpush3.bf16.msra.mxu1 %v1180_v63  ;;  %1066 = vmatprep.subr.bf16.mxu0 %v1181_v0  ;;  %v104_v45 = vmul.f32 15.0, %v96_v39  ;;  %v110_v48 = vadd.f32 0.5, %v102_v43  ;;  %v136_v63 = vpack.c.bf16 %v127_v59, %v127_v59  ;;  %v1209_v0 = vld [vmem:[#allocation8 + $0x38] sm:$0xff]  }
  0x4a   :  { %1088 = vmatprep.subr.bf16.mxu1 %v1182_v5  ;;  %v101_v46 = vmul.f32 15.0, %v93_v40  ;;  %v1213_v5 = vld [vmem:[#allocation8 + $0x18] sm:$0xff]   ;;  %p1284_p4 = por %p1283_p3, %p1282_p2 }
  0x4b   :  { %v112_v49 = vadd.f32 0.5, %v104_v45  ;;  %v118_v52 = vfloor.f32 %v110_v48 }
  0x4c   :  { %1067 = vmatpush3.bf16.msra.mxu0 %v1183_v6  ;;  %v109_v50 = vadd.f32 0.5, %v101_v46  ;;  %v1214_v6 = vld [vmem:[#allocation8 + $0x10] sm:$0xff]   ;;  %p1285_p5 = pnand %p1284_p4, %p1278_p1 }
  0x4d   :  { %1089 = vmatpush3.bf16.msra.mxu1 %v1184_v7  ;;  %1068 = vmatprep.subr.bf16.mxu0 %v1185_v8  ;;  %v120_v53 = vfloor.f32 %v112_v49  ;;  %v126_v56 = vmul.f32 0.06666667, %v118_v52  ;;  %v1215_v7 = vld [vmem:[#allocation8 + $0x8] sm:$0xff]   ;;  %v1216_v8 = vld [vmem:[#allocation8] sm:$0xff]  }
  0x4e   :  { %1090 = vmatprep.subr.bf16.mxu1 %v1186_v9  ;;  %v117_v54 = vfloor.f32 %v109_v50 }
  0x4f   :  { %v128_v57 = vmul.f32 0.06666667, %v120_v53  ;;  %v135_v60 = vpack.c.bf16 %v126_v56, %v126_v56 }
  0x50   :  { %1069 = vmatpush3.bf16.msra.mxu0 %v1187_v10  ;;  %v125_v58 = vmul.f32 0.06666667, %v117_v54 }
  0x51   :  { %1091 = vmatpush3.bf16.msra.mxu1 %v1188_v11  ;;  %1070 = vmatprep.subr.bf16.mxu0 %v1189_v12  ;;  %v137_v61 = vpack.c.bf16 %v128_v57, %v128_v57 }
  0x52   :  { %1092 = vmatprep.subr.bf16.mxu1 %v1190_v13  ;;  %v134_v62 = vpack.c.bf16 %v125_v58, %v125_v58  ;;  %762 = vmatprep.mubr.bf16.mxu0 %v135_v60 }
  0x53   :  { %802 = vmatprep.mubr.bf16.mxu1 %v137_v61 }
  0x54   :  { %1071 = vmatpush3.bf16.msra.mxu0 %v1191_v14 }
  0x55   :  { %1093 = vmatpush3.bf16.msra.mxu1 %v1192_v15  ;;  %1072 = vmatprep.subr.bf16.mxu0 %v1193_v16 }
  0x56   :  { %1094 = vmatprep.subr.bf16.mxu1 %v1194_v17 }
  0x58   :  { %1073 = vmatpush3.bf16.msra.mxu0 %v1195_v18 }
  0x59   :  { %1095 = vmatpush3.bf16.msra.mxu1 %v1196_v19  ;;  %1074 = vmatprep.subr.bf16.mxu0 %v1197_v20 }
  0x5a   :  { %1096 = vmatprep.subr.bf16.mxu1 %v1198_v21 }
  0x5c   :  { %1075 = vmatpush3.bf16.msra.mxu0 %v1199_v22 }
  0x5d   :  { %1097 = vmatpush3.bf16.msra.mxu1 %v1200_v23  ;;  %1076 = vmatprep.subr.bf16.mxu0 %v1201_v24 }
  0x5e   :  { %1098 = vmatprep.subr.bf16.mxu1 %v1202_v25 }
  0x60   :  { %1077 = vmatpush3.bf16.msra.mxu0 %v1203_v26 }
  0x61   :  { %1099 = vmatpush3.bf16.msra.mxu1 %v1204_v27  ;;  %1078 = vmatprep.subr.bf16.mxu0 %v1205_v33 }
  0x62   :  { %1100 = vmatprep.subr.bf16.mxu1 %v1206_v37 }
  0x64   :  { %1079 = vmatpush3.bf16.msra.mxu0 %v1207_v42 }
  0x65   :  { %1101 = vmatpush3.bf16.msra.mxu1 %v1208_v44  ;;  %1117 = vmatprep.subr.bf16.mxu0 %v1308_v1 }
  0x67   :  { %763 = vmatmul.mubr.bf16.vlgmr.msra.gmra.mxu0 %v134_v62 }
  0x68   :  { %803 = vmatmul.mubr.bf16.vlgmr.msra.gmra.mxu1 %v136_v63  ;;  %1118 = vmatpush3.bf16.msra.mxu0 %v1209_v0 }
  0x69   :  { %1119 = vmatprep.subr.bf16.mxu0 %v1308_v1  ;;  %1133 = vmatprep.mubr.msk.bf16.mxu0 %vm1309_vm0, %v1308_v1 }
  0x6c   :  { %1120 = vmatpush3.bf16.msra.mxu0 %v1210_v2 }
  0x6d   :  { %1121 = vmatprep.subr.bf16.mxu0 %v1308_v1 }
  0x70   :  { %1122 = vmatpush3.bf16.msra.mxu0 %v1211_v3 }
  0x71   :  { %1123 = vmatprep.subr.bf16.mxu0 %v1308_v1 }
  0x74   :  { %1124 = vmatpush3.bf16.msra.mxu0 %v1212_v4 }
  0x75   :  { %1125 = vmatprep.subr.bf16.mxu0 %v1308_v1 }
  0x78   :  { %1126 = vmatpush3.bf16.msra.mxu0 %v1213_v5 }
  0x79   :  { %1127 = vmatprep.subr.bf16.mxu0 %v1308_v1 }
  0x7c   :  { %1128 = vmatpush3.bf16.msra.mxu0 %v1214_v6 }
  0x7d   :  { %1129 = vmatprep.subr.bf16.mxu0 %v1308_v1 }
  0x80   :  { %1130 = vmatpush3.bf16.msra.mxu0 %v1215_v7 }
  0x81   :  { %1131 = vmatprep.subr.bf16.mxu0 %v1308_v1 }
  0x84   :  { %1132 = vmatpush3.bf16.msra.mxu0 %v1216_v8 }
 0x107   :  { %v1036_v9 = vpop.f32.mrf.mxu0 }
 0x108   :  { %v1058_v10 = vpop.f32.mrf.mxu1 }
 0x109   :  { %v1037_v11 = vpop.f32.mrf.mxu0 }
 0x10a   :  { %v1059_v12 = vpop.f32.mrf.mxu1  ;;  %v1038_v17 = vadd.f32 %v1037_v11, %v1036_v9 }
 0x10b   :  { %v1039_v13 = vpop.f32.mrf.mxu0  ;;  %v1060_v18 = vadd.f32 %v1059_v12, %v1058_v10 }
 0x10c   :  { %v1061_v14 = vpop.f32.mrf.mxu1 }
 0x10d   :  { %v1040_v15 = vpop.f32.mrf.mxu0  ;;  %v725_v22 = vadd.f32 %v1060_v18, %v1038_v17 }
 0x10e   :  { %v1062_v16 = vpop.f32.mrf.mxu1 }
 0x127   :  { %v1080_v19 = vpop.f32.mrf.mxu0 }
 0x128   :  { %v1102_v20 = vpop.f32.mrf.mxu1 }
 0x129   :  { %v1081_v21 = vpop.f32.mrf.mxu0 }
 0x12a   :  { %v1082_v23 = vadd.f32 %v1081_v21, %v1080_v19  ;;  %v1103_v24 = vpop.f32.mrf.mxu1 }
 0x12b   :  { %v1083_v25 = vpop.f32.mrf.mxu0  ;;  %v1104_v27 = vadd.f32 %v1103_v24, %v1102_v20 }
 0x12c   :  { %v765_v26 = vadd.f32 %v1082_v23, %v725_v22  ;;  %v1105_v28 = vpop.f32.mrf.mxu1 }
 0x12d   :  { %v1084_v30 = vpop.f32.mrf.mxu0 }
 0x12e   :  { %v805_v31 = vadd.f32 %v1104_v27, %v765_v26  ;;  %v1106_v32 = vpop.f32.mrf.mxu1 }
 0x130   :  { %v810_v33 = vadd.f32 %v946_v29, %v805_v31 }
 0x132   :  { %v816_v34 = vmax.f32 %v810_v33, 0.0 }
 0x134   :  { %v817_v35 = vpack.c.bf16 %v816_v34, %v816_v34 }
 0x136   :  { %1134 = vmatmul.mubr.bf16.vlgmr.msra.gmra.mxu0 %v817_v35 }
 0x1f6   :  { %v923_v37 = vpop.f32.mrf.mxu0 }
 0x1f7   :  { %v924_v38 = vadd.f32 %v1011_v36, %v923_v37 }
 0x1f8   :  { %v1135_v39 = vpop.f32.mrf.mxu0 }
 0x1f9   :  { %929 = vst [vmem:[#allocation9] sm:$0xff] %v924_v38 }
 0x1fa   :  { %v926_v40 = vpop.f32.mrf.mxu0 }
 0x1fb   :  { %1288 = shalt.err (!%p1285_p5)
}
 0x1fc   :  { %939 = dma.vmem_to_hbm [thread:$0]  %s937_s12, 128, %s1364_s5, [#allocation5]   ;;  %v1136_v41 = vpop.f32.mrf.mxu0 }
 0x1fd   :  { %1301 = dma.done.wait [#allocation5], 128  }
 0x1fe   :  { %1302 = vsyncadd [#allocation5], 4294967168 }
 0x1ff   :  { %943 = vsyncpa [#allocation4], 1 }
 0x200   :  { %944 = vsyncpa [#allocation7], 1 }
 0x201   :  { %945 = vsyncpa [#allocation5], 1 }

</bundles_post_ra>
